<compile_context>
chip_gen: v7x
topology: tpu7x:2x2x1
jax: 0.10.0
libtpu: 0.0.40
codegen_flags: <defaults>
</compile_context>

<pallas_src>
import functools

import jax
import jax.numpy as jnp
from jax import lax
from jax.experimental import pallas as pl
from jax.experimental.pallas import tpu as pltpu

_LANES = 128
_SUBLANES = 8
_GROUP_ELEMS = _SUBLANES * _LANES           # 1024 elements per (8, 128) group
_TARGET_STEP_INPUT_BYTES = 4 * 1024 * 1024  # ~2 MiB per input per grid step
_NUM_CORE_SPLITS = 2                        # leading "parallel" axis (v7x 2 TCs)


def _l1_sum_kernel(pre_ref, y_ref, acc_ref, *, total_groups, groups_per_tile,
                   inner_steps):
    # pre_ref / y_ref: (TG, 8, 128) native dtype; acc_ref: (1, 8, 128) f32
    # output block, VMEM-resident accumulator across the inner grid axis.
    c = pl.program_id(0)
    i = pl.program_id(1)

    @pl.when(i == 0)
    def _init():
        acc_ref[...] = jnp.zeros_like(acc_ref)

    d = jnp.abs(pre_ref[...].astype(jnp.float32) -
                y_ref[...].astype(jnp.float32))          # (TG, 8, 128) f32

    tile_id = c * inner_steps + i                        # un-clamped logical tile
    grp_start = tile_id * groups_per_tile

    @pl.when(grp_start + groups_per_tile <= total_groups)
    def _full_tile():
        # Pure cross-vreg VALU adds; no XLU, no scalar RMW per step.
        acc_ref[...] += jnp.sum(d, axis=0, keepdims=True)

    @pl.when(grp_start + groups_per_tile > total_groups)
    def _ragged_or_dup_tile():
        # Last (partial) tile, or a duplicated tile from the 2-way split whose
        # DMA window was clamped in the index_map: zero everything past the
        # real extent so garbage / re-read data contributes nothing.
        grp_idx = grp_start + lax.broadcasted_iota(jnp.int32, d.shape, 0)
        masked = jnp.where(grp_idx < total_groups, d, 0.0)
        acc_ref[...] += jnp.sum(masked, axis=0, keepdims=True)


def _round_up(x: int, m: int) -> int:
    return ((x + m - 1) // m) * m


def predict_loss(pre: jax.Array, y: jax.Array, *,
                 groups_per_tile: int | None = None) -> jax.Array:
    """Equivalent of Predict_Loss.forward(pre, y)."""
    if pre.shape != tuple(y.shape) + (1,):
        raise ValueError(
            f"expected pre.shape == y.shape + (1,), got {pre.shape} vs {y.shape}")

    pre_flat = pre.reshape(-1)     # same element count / order as y.unsqueeze(-1)
    y_flat = y.reshape(-1)
    n = pre_flat.shape[0]

    if n % _GROUP_ELEMS == 0:
        total_groups = n // _GROUP_ELEMS          # zero-copy: reshape is a bitcast
    else:
        # Misaligned tail only: pad with zeros (|0-0| = 0 adds nothing).  This
        # is the sole case that materializes a copy of the inputs.
        padded_n = _round_up(n, _GROUP_ELEMS)
        pre_flat = jnp.pad(pre_flat, (0, padded_n - n))
        y_flat = jnp.pad(y_flat, (0, padded_n - n))
        total_groups = padded_n // _GROUP_ELEMS

    pre3d = pre_flat.reshape(total_groups, _SUBLANES, _LANES)
    y3d = y_flat.reshape(total_groups, _SUBLANES, _LANES)

    if groups_per_tile is None:
        step_bytes_per_group = _GROUP_ELEMS * (pre.dtype.itemsize +
                                               y.dtype.itemsize)
        groups_per_tile = max(1, _TARGET_STEP_INPUT_BYTES // step_bytes_per_group)
    groups_per_tile = min(groups_per_tile, total_groups)

    num_tiles = pl.cdiv(total_groups, groups_per_tile)
    inner_steps = pl.cdiv(num_tiles, _NUM_CORE_SPLITS)
    grid = (_NUM_CORE_SPLITS, inner_steps)

    def in_index_map(c, i):
        # Clamp so the DMA window always stays in-bounds; the kernel masks any
        # groups past `total_groups` (including whole duplicated tiles).
        return (jnp.minimum(c * inner_steps + i, num_tiles - 1), 0, 0)

    kernel = functools.partial(
        _l1_sum_kernel,
        total_groups=total_groups,
        groups_per_tile=groups_per_tile,
        inner_steps=inner_steps)

    bytes_accessed = (total_groups * _GROUP_ELEMS *
                      (pre.dtype.itemsize + y.dtype.itemsize) +
                      _NUM_CORE_SPLITS * _SUBLANES * _LANES * 4)

    partials = pl.pallas_call(
        kernel,
        out_shape=jax.ShapeDtypeStruct(
            (_NUM_CORE_SPLITS, _SUBLANES, _LANES), jnp.float32),
        grid_spec=pltpu.PrefetchScalarGridSpec(
            num_scalar_prefetch=0,
            grid=grid,
            in_specs=[
                pl.BlockSpec((groups_per_tile, _SUBLANES, _LANES), in_index_map),
                pl.BlockSpec((groups_per_tile, _SUBLANES, _LANES), in_index_map),
            ],
            out_specs=pl.BlockSpec((1, _SUBLANES, _LANES),
                                   lambda c, i: (c, 0, 0)),
        ),
        compiler_params=pltpu.CompilerParams(
            dimension_semantics=("parallel", "arbitrary"),
            vmem_limit_bytes=32 * 1024 * 1024,
        ),
        cost_estimate=pl.CostEstimate(
            flops=3 * n, transcendentals=0, bytes_accessed=bytes_accessed),
    )(pre3d, y3d)

    # Tiny (2, 8, 128) partial-sum reduce in plain XLA.
    return jnp.sum(partials)


def _reference(pre, y):
    # Pure-JAX reference: torch.nn.L1Loss(reduction='sum')(pre.float(),
    # y.unsqueeze(-1).float())
    return jnp.sum(jnp.abs(pre.astype(jnp.float32) -
                           y.astype(jnp.float32)[..., None]))


if __name__ == "__main__":
    key = jax.random.PRNGKey(0)
    k1, k2, k3, k4 = jax.random.split(key, 4)

    # Check 1: module-typical small shapes (batch of 4 sequences of 24 hourly
    # predictions, trailing singleton channel).  n = 96 exercises the
    # misaligned-tail (pad) path.
    B, T = 4, 24
    pre = jax.random.normal(k1, (B, T, 1), dtype=jnp.float32)
    y = jax.random.normal(k2, (B, T), dtype=jnp.float32)
    loss = predict_loss(pre, y)
    jax.block_until_ready(loss)
    ref = _reference(pre, y)
    assert jnp.allclose(loss, ref, atol=1e-2, rtol=1e-4), (loss, ref)

    # Check 2: lane/sublane-aligned (zero-copy) path with a small forced tile
    # so the multi-step accumulator, the ragged last tile, and the duplicated
    # (clamped + masked) tile of the 2-way split are all exercised:
    # 13 groups, 2 groups/tile -> 7 tiles over the size-2 parallel axis.
    B2, T2 = 13, 1024
    pre2 = jax.random.normal(k3, (B2, T2, 1), dtype=jnp.float32)
    y2 = jax.random.normal(k4, (B2, T2), dtype=jnp.float32)
    loss2 = predict_loss(pre2, y2, groups_per_tile=2)
    jax.block_until_ready(loss2)
    ref2 = _reference(pre2, y2)
    assert jnp.allclose(loss2, ref2, atol=1e-2, rtol=1e-4), (loss2, ref2)

    print("KERNEL_OK")
</pallas_src>

<mosaic_0001>
module attributes {stable_mosaic.version = 11 : i64} {
  func.func @_l1_sum_kernel(%arg0: i32, %arg1: i32, %arg2: memref<1x8x128xf32, #tpu.memory_space<vmem>>, %arg3: memref<1x8x128xf32, #tpu.memory_space<vmem>>, %arg4: memref<1x8x128xf32, #tpu.memory_space<vmem>>) attributes {dimension_semantics = [#tpu.dimension_semantics<parallel>, #tpu.dimension_semantics<arbitrary>], iteration_bounds = array<i64: 2, 1>, scalar_prefetch = 0 : i64, scratch_operands = 0 : i64, tpu.core_type = #tpu.core_type<tc>, window_params = [{transform_indices = @transform_0, window_bounds = array<i64: 1, 8, 128>}, {transform_indices = @transform_1, window_bounds = array<i64: 1, 8, 128>}, {transform_indices = @transform_2, window_bounds = array<i64: 1, 8, 128>}]} {
    %c0_i32 = arith.constant 0 : i32
    %0 = arith.cmpi eq, %arg1, %c0_i32 : i32
    %1 = arith.extui %0 : i1 to i32
    %c0_i32_0 = arith.constant 0 : i32
    %2 = arith.cmpi ne, %1, %c0_i32_0 : i32
    scf.if %2 {
      %cst = arith.constant 0.000000e+00 : f32
      %18 = vector.broadcast %cst : f32 to vector<1x8x128xf32>
      %c0_13 = arith.constant 0 : index
      %c0_14 = arith.constant 0 : index
      %c0_15 = arith.constant 0 : index
      %19 = vector.load %arg4[%c0_13, %c0_14, %c0_15] : memref<1x8x128xf32, #tpu.memory_space<vmem>>, vector<1x8x128xf32>
      tpu.vector_store %arg4[%c0_13, %c0_14, %c0_15], %18 {strides = array<i32>} : memref<1x8x128xf32, #tpu.memory_space<vmem>>, vector<1x8x128xf32>,
    } else {
    }
    %c0 = arith.constant 0 : index
    %c0_1 = arith.constant 0 : index
    %c0_2 = arith.constant 0 : index
    %3 = vector.load %arg2[%c0, %c0_1, %c0_2] : memref<1x8x128xf32, #tpu.memory_space<vmem>>, vector<1x8x128xf32>
    %c0_3 = arith.constant 0 : index
    %c0_4 = arith.constant 0 : index
    %c0_5 = arith.constant 0 : index
    %4 = vector.load %arg3[%c0_3, %c0_4, %c0_5] : memref<1x8x128xf32, #tpu.memory_space<vmem>>, vector<1x8x128xf32>
    %5 = arith.subf %3, %4 : vector<1x8x128xf32>
    %6 = math.absf %5 : vector<1x8x128xf32>
    %c1_i32 = arith.constant 1 : i32
    %7 = arith.muli %arg0, %c1_i32 : i32
    %8 = arith.addi %7, %arg1 : i32
    %c1_i32_6 = arith.constant 1 : i32
    %9 = arith.muli %8, %c1_i32_6 : i32
    %c1_i32_7 = arith.constant 1 : i32
    %10 = arith.addi %9, %c1_i32_7 : i32
    %c1_i32_8 = arith.constant 1 : i32
    %11 = arith.cmpi sle, %10, %c1_i32_8 : i32
    %12 = arith.extui %11 : i1 to i32
    %c0_i32_9 = arith.constant 0 : i32
    %13 = arith.cmpi ne, %12, %c0_i32_9 : i32
    scf.if %13 {
      %c0_13 = arith.constant 0 : index
      %c0_14 = arith.constant 0 : index
      %c0_15 = arith.constant 0 : index
      %18 = vector.load %arg4[%c0_13, %c0_14, %c0_15] : memref<1x8x128xf32, #tpu.memory_space<vmem>>, vector<1x8x128xf32>
      %cst = arith.constant dense<0.000000e+00> : vector<8x128xf32>
      %19 = vector.multi_reduction <add>, %6, %cst [0] : vector<1x8x128xf32> to vector<8x128xf32>
      %20 = vector.shape_cast %19 : vector<8x128xf32> to vector<1x8x128xf32>
      %21 = arith.addf %18, %20 : vector<1x8x128xf32>
      %c0_16 = arith.constant 0 : index
      %c0_17 = arith.constant 0 : index
      %c0_18 = arith.constant 0 : index
      %22 = vector.load %arg4[%c0_16, %c0_17, %c0_18] : memref<1x8x128xf32, #tpu.memory_space<vmem>>, vector<1x8x128xf32>
      tpu.vector_store %arg4[%c0_16, %c0_17, %c0_18], %21 {strides = array<i32>} : memref<1x8x128xf32, #tpu.memory_space<vmem>>, vector<1x8x128xf32>,
    } else {
    }
    %c1_i32_10 = arith.constant 1 : i32
    %14 = arith.addi %9, %c1_i32_10 : i32
    %c1_i32_11 = arith.constant 1 : i32
    %15 = arith.cmpi sgt, %14, %c1_i32_11 : i32
    %16 = arith.extui %15 : i1 to i32
    %c0_i32_12 = arith.constant 0 : i32
    %17 = arith.cmpi ne, %16, %c0_i32_12 : i32
    scf.if %17 {
      %18 = tpu.iota {dimensions = array<i32: 0>} : vector<1x8x128xi32>
      %19 = vector.broadcast %9 : i32 to vector<1x8x128xi32>
      %20 = arith.addi %19, %18 : vector<1x8x128xi32>
      %c1_i32_13 = arith.constant 1 : i32
      %21 = vector.broadcast %c1_i32_13 : i32 to vector<1x8x128xi32>
      %22 = arith.cmpi slt, %20, %21 : vector<1x8x128xi32>
      %cst = arith.constant 0.000000e+00 : f32
      %23 = vector.broadcast %cst : f32 to vector<1x8x128xf32>
      %24 = arith.select %22, %6, %23 : vector<1x8x128xi1>, vector<1x8x128xf32>
      %c0_14 = arith.constant 0 : index
      %c0_15 = arith.constant 0 : index
      %c0_16 = arith.constant 0 : index
      %25 = vector.load %arg4[%c0_14, %c0_15, %c0_16] : memref<1x8x128xf32, #tpu.memory_space<vmem>>, vector<1x8x128xf32>
      %cst_17 = arith.constant dense<0.000000e+00> : vector<8x128xf32>
      %26 = vector.multi_reduction <add>, %24, %cst_17 [0] : vector<1x8x128xf32> to vector<8x128xf32>
      %27 = vector.shape_cast %26 : vector<8x128xf32> to vector<1x8x128xf32>
      %28 = arith.addf %25, %27 : vector<1x8x128xf32>
      %c0_18 = arith.constant 0 : index
      %c0_19 = arith.constant 0 : index
      %c0_20 = arith.constant 0 : index
      %29 = vector.load %arg4[%c0_18, %c0_19, %c0_20] : memref<1x8x128xf32, #tpu.memory_space<vmem>>, vector<1x8x128xf32>
      tpu.vector_store %arg4[%c0_18, %c0_19, %c0_20], %28 {strides = array<i32>} : memref<1x8x128xf32, #tpu.memory_space<vmem>>, vector<1x8x128xf32>,
    } else {
    }
    return
  }
  func.func @transform_0(%arg0: i32, %arg1: i32) -> (i32, i32, i32) {
    %c1_i32 = arith.constant 1 : i32
    %0 = arith.muli %arg0, %c1_i32 : i32
    %1 = arith.addi %0, %arg1 : i32
    %c0_i32 = arith.constant 0 : i32
    %2 = arith.minsi %1, %c0_i32 : i32
    %c0_i32_0 = arith.constant 0 : i32
    %c0_i32_1 = arith.constant 0 : i32
    %c0_i32_2 = arith.constant 0 : i32
    return %2, %c0_i32_0, %c0_i32_1 : i32, i32, i32
  }
  func.func @transform_1(%arg0: i32, %arg1: i32) -> (i32, i32, i32) {
    %c1_i32 = arith.constant 1 : i32
    %0 = arith.muli %arg0, %c1_i32 : i32
    %1 = arith.addi %0, %arg1 : i32
    %c0_i32 = arith.constant 0 : i32
    %2 = arith.minsi %1, %c0_i32 : i32
    %c0_i32_0 = arith.constant 0 : i32
    %c0_i32_1 = arith.constant 0 : i32
    %c0_i32_2 = arith.constant 0 : i32
    return %2, %c0_i32_0, %c0_i32_1 : i32, i32, i32
  }
  func.func @transform_2(%arg0: i32, %arg1: i32) -> (i32, i32, i32) {
    %c0_i32 = arith.constant 0 : i32
    %c0_i32_0 = arith.constant 0 : i32
    %c0_i32_1 = arith.constant 0 : i32
    return %arg0, %c0_i32, %c0_i32_0 : i32, i32, i32
  }
}

</mosaic_0001>

<bundles_post_ra>
// kernel: tpu_custom_call.1
= control target key start
LH: loop header
LB: loop body
LE: loop exit
PB: predicated region body
PF: predicated region fallthrough
CT: control target
= control target key end

     0   :  { %7 = vsyncpa [#allocation3], 0  ;;  %s872_s0 = inlined_call_operand.hbm [shape: f32[1,8,128], index: 0, kind: input, shape index: {}]   ;;  %s873_s1 = inlined_call_operand.hbm [shape: f32[1,8,128], index: 1, kind: input, shape index: {}]   ;;  %s874_s2 = inlined_call_operand.hbm [shape: f32[2,8,128], index: 2, kind: output, shape index: {}]  }
   0x1   :  { %9 = vsyncpa [#allocation3 + $0x1], 0 }
   0x2   :  { %10 = vsyncpa [#allocation6], 0 }
   0x3   :  { %12 = vsyncpa [#allocation6 + $0x1], 0 }
   0x4   :  { %13 = vsyncpa [#allocation4], 0 }
   0x5   :  { %15 = vsyncpa [#allocation4 + $0x1], 0  ;;  %s675_s9 = smov 0   ;;  %s677_s10 = smov 0  }
   0x6   :  { %s679_s11 = smov 0   ;;  %s681_s12 = smov 0  }
   0x7   :  { %s683_s13 = smov 0   ;;  %s685_s14 = smov 0  }
   0x8   :  { %s687_s15 = smov 0   ;;  %s689_s16 = smov 0  }
   0x9 LB: > { %s377_s17 = sadd.s32 4294967295, %s654_s16   ;;  %s378_s18 = sadd.s32 4294967294, %s654_s16   ;;  %s654_s16 = sphi %s689_s16, %s21_s16   ;;  %s650_s15 = sphi %s687_s15, %s895_s15   ;;  %s646_s14 = sphi %s685_s14, %s894_s14   ;;  %s642_s13 = sphi %s683_s13, %s862_s13   ;;  %s638_s12 = sphi %s681_s12, %s893_s12   ;;  %s634_s11 = sphi %s679_s11, %s892_s11   ;;  %s630_s10 = sphi %s677_s10, %s891_s10   ;;  %s626_s9 = sphi %s675_s9, %s890_s9  }
   0xa   : > { %s33_s19 = sadd.s32 1, %s650_s15  ;;  %p623_p1 = scmp.ne.s32.totalorder %s642_s13, 0 }
   0xb   : > { %p35_p0 = scmp.ge.s32.totalorder %s33_s19, 2  ;;  %p54_p2 = scmp.eq.s32.totalorder %s654_s16, 0 }
   0xc   : > { %p59_p3 = scmp.ne.s32.totalorder %s642_s13, %s638_s12  ;;  %p60_p5 = scmp.eq.s32.totalorder %s377_s17, 0 }
   0xd   : > { %s897_s19 = smov (%p35_p0, %s33_s19), 0  ;;  %p721_p4 = por %p623_p1, %p54_p2 }
   0xe   : > { %p725_p6 = por %p60_p5, %p59_p3  ;;  %s101_s22 = ssub.s32 %s650_s15, %s897_s19 }
   0xf   : > { %p102_p7 = scmp.eq.s32.totalorder %s101_s22, 0  ;;  %s104_s23 = sadd.s32 1, %s634_s11 }
  0x10   : > { %s878_s21 = scalar_select %p725_p6, 1, 0 }
  0x11   : > { %s733_s24 = scalar_select %p102_p7, %s634_s11, %s104_s23  }
  0x12   : > { %p114_p8 = scmp.ne.s32.totalorder %s634_s11, %s630_s10  ;;  %p115_p9 = scmp.eq.s32.totalorder %s377_s17, 1 }
  0x13   : > { %p120_p10 = scmp.ne.s32.totalorder %s630_s10, %s626_s9  ;;  %p121_p11 = scmp.eq.s32.totalorder %s378_s18, 1 }
  0x14   : > { %p739_p12 = por %p115_p9, %p114_p8  ;;  %p412_p1 = scmp.lt.s32.totalorder %s654_s16, 2 }
  0x15   : > { %p744_p0 = por %p121_p11, %p120_p10  ;;  %s656_s27 = smov [#allocation2]  }
  0x16   : > { %s879_s25 = scalar_select %p739_p12, 1, 0 }
  0x17   : > { %s880_s26 = scalar_select %p744_p0, 1, 0 }
  0x18   : > { %s155_s28 = sshll.u32 %s656_s27, 4  ;;  %p751_p2 = pnand %p412_p1, %p721_p4  ;;  %s156_s28 = int_to_ptr.vmem [resolvable:$true] %s155_s28 }
  0x19   : > { %s487_s4 = scalar_lea.hbm %s872_s0, 128 }
  0x1a   : > { %p488_p7 = scmp.ne.s32.totalorder %s872_s0, %s487_s4  ;;  %p489_p8 = pneg %p751_p2 }
  0x1b   : > { %p494_p10 = scmp.lt.u32.totalorder %s487_s4, %s487_s4  ;;  %p496_p11 = scmp.lt.u32.totalorder %s487_s4, %s872_s0 }
  0x1c   : > { %p490_p4 = pnand %p489_p8, %p488_p7 }
  0x1d   : > { %p497_p1 = por %p496_p11, %p494_p10 }
  0x1e   : > { %p491_p9 = pneg %p490_p4 }
  0x20   : > { %p498_p13 = pnand %p497_p1, %p491_p9 }
  0x22   : > { %501 = shalt.err (!%p498_p13)
}
  0x23   : > { %s502_s12 = scalar_lea.vmem %s156_s28, 128  ;;  %s509_s17 = scalar_lea.vmem %s156_s28, 256 }
  0x24   : > { %p503_p3 = scmp.ne.s32.totalorder %s156_s28, %s502_s12  ;;  %p510_p12 = scmp.lt.s32.totalorder %s156_s28, %s156_s28 }
  0x25   : > { %p511_p6 = scmp.lt.s32.totalorder %s509_s17, %s502_s12 }
  0x26   : > { %p505_p5 = pnand %p503_p3, %p489_p8 }
  0x27   : > { %p512_p7 = por %p511_p6, %p510_p12 }
  0x28   : > { %p506_p0 = pneg %p505_p5 }
  0x2a   : > { %p513_p4 = pnand %p512_p7, %p506_p0 }
  0x2c   : > { %516 = shalt.err (!%p513_p4)
}
  0x2d   : > { %404 = dma.hbm_to_vmem [thread:$0]  (!%p751_p2), %s872_s0, 128, %s156_s28, [#allocation3]  }
  0x2e   : > { %p882_p13 = scmp.lt.s32.totalorder %s654_s16, 3  ;;  %p883_p9 = scmp.ge.s32.totalorder %s654_s16, 1 }
  0x2f   : > { %s657_s23 = smov [#allocation5]   ;;  %s517_s4 = scalar_lea.hbm %s873_s1, 128 }
  0x30   : > { %p783_p10 = pnand %p883_p9, %p882_p13  ;;  %s176_s27 = sshll.u32 %s657_s23, 4  ;;  %s177_s27 = int_to_ptr.vmem [resolvable:$true] %s176_s27 }
  0x31   : > { %p518_p6 = scmp.ne.s32.totalorder %s873_s1, %s517_s4  ;;  %p524_p3 = scmp.lt.u32.totalorder %s517_s4, %s517_s4 }
  0x32   : > { %s884_s22 = scalar_select %p783_p10, 1, 0 }
  0x33   : > { %p520_p12 = pnand %p518_p6, %p489_p8  ;;  %p526_p5 = scmp.lt.u32.totalorder %s517_s4, %s873_s1 }
  0x35   : > { %p521_p0 = pneg %p520_p12  ;;  %p527_p11 = por %p526_p5, %p524_p3 }
  0x37   : > { %p528_p1 = pnand %p527_p11, %p521_p0 }
  0x39   : > { %531 = shalt.err (!%p528_p1)
}
  0x3a   : > { %s532_s8 = scalar_lea.vmem %s177_s27, 128  ;;  %s539_s12 = scalar_lea.vmem %s177_s27, 256 }
  0x3b   : > { %p533_p7 = scmp.ne.s32.totalorder %s177_s27, %s532_s8  ;;  %p540_p9 = scmp.lt.s32.totalorder %s177_s27, %s177_s27 }
  0x3c   : > { %p541_p10 = scmp.lt.s32.totalorder %s539_s12, %s532_s8 }
  0x3d   : > { %p535_p4 = pnand %p533_p7, %p489_p8 }
  0x3e   : > { %p542_p6 = por %p541_p10, %p540_p9 }
  0x3f   : > { %p536_p13 = pneg %p535_p4 }
  0x41   : > { %p543_p12 = pnand %p542_p6, %p536_p13 }
  0x43   : > { %546 = shalt.err (!%p543_p12)
}
  0x44   : > { %407 = dma.hbm_to_vmem [thread:$0]  (!%p751_p2), %s873_s1, 128, %s177_s27, [#allocation6]  }
  0x45   : > { %p885_p0 = scmp.ne.s32.totalorder %s884_s22, 0 }
  0x46   : > { %s187_s20 = sand.u32 (!%p885_p0), 1, %s642_s13   ;;  %p886_p8 = scmp.ne.s32.totalorder (!%p885_p0), %s878_s21, 0 }
  0x47   : > { %185 = sbr.rel (%p885_p0) target bundleno = 130 (0x82), region = 28  ;;  %s386_s23 = sshll.u32 (!%p885_p0), %s187_s20, 3 }
  0x48   : > { %s188_s30 = scalar_lea.sflag (!%p885_p0), [#allocation3], %s187_s20  ;;  %s191_s3 = scalar_lea.vmem (!%p885_p0), [#allocation2], %s386_s23 }
  0x4e   : > { %612 = dma.done.wait (%p886_p8), %s188_s30, 128  }
  0x4f   : > { %614 = vsyncadd (%p886_p8), %s188_s30, 4294967168  ;;  %s197_s29 = scalar_lea.sflag [#allocation6], %s187_s20  ;;  %s200_s4 = scalar_lea.vmem [#allocation5], %s386_s23 }
  0x50   : > { %616 = dma.done.wait (%p886_p8), %s197_s29, 128  }
  0x51   : > { %618 = vsyncadd (%p886_p8), %s197_s29, 4294967168  ;;  %s223_s22 = sand.u32 1, %s630_s10   ;;  %s242_s27 = sadd.s32 1, %s646_s14  ;;  %v658_v0 = vmov 0.0   ;;  %v237_v1 = vld [vmem:[%s191_s3] sm:$0xff]  ;;  %v238_v2 = vld [vmem:[%s200_s4] sm:$0xff] }
  0x52   : > { %s388_s5 = sshll.u32 %s223_s22, 3  ;;  %v239_v3 = vsub.f32 %v237_v1, %v238_v2  ;;  %p389_p2 = scmp.gt.s32.totalorder %s242_s27, 1 }
  0x53   : > { %s225_s6 = scalar_lea.vmem [#allocation7], %s388_s5 }
  0x54   : > { %236 = vst [vmem:[%s225_s6] sm:$0xff] %v658_v0  ;;  %v240_v4 = vand.u32 2147483647, %v239_v3  ;;  %246 = sbr.rel (%p389_p2) target bundleno = 95 (0x5f), region = 44 }
  0x5b   : > { %v247_v5 = vld [vmem:[%s225_s6] sm:$0xff] }
  0x5c   : > { %v249_v6 = vadd.f32 %v247_v5, %v240_v4 }
  0x5e   : > { %250 = vst [vmem:[%s225_s6] sm:$0xff] %v249_v6 }
  0x5f PF: > { %p390_p10 = scmp.le.s32.totalorder %s242_s27, 1 }
  0x60   : > { %v255_v7 = vstv (!%p390_p10), %s646_s14 }
  0x61   : > { %254 = sbr.rel (%p390_p10) target bundleno = 105 (0x69), region = 48  ;;  %vm256_vm0 = vcmp.lt.s32.totalorder (!%p390_p10), %v255_v7, 1 }
  0x62   : > { %v257_v9 = vsel (!%p390_p10), %vm256_vm0, %v240_v4, 0.0 }
  0x65   : > { %v258_v8 = vld [vmem:[%s225_s6] sm:$0xff] (!%p390_p10) }
  0x66   : > { %v260_v10 = vadd.f32 (!%p390_p10), %v258_v8, %v257_v9 }
  0x68   : > { %261 = vst [vmem:[%s225_s6] sm:$0xff] %v260_v10 }
  0x69 PF: > { %s392_s21 = sshll.u32 %s646_s14, 7  ;;  %s276_s12 = sshll.u32 %s225_s6, 4  ;;  %s277_s12 = int_to_ptr.vmem [resolvable:$true] %s276_s12 }
  0x6a   : > { %s825_s8 = scalar_lea.hbm %s874_s2, %s392_s21  ;;  %s263_s17 = scalar_lea.sflag [#allocation4], %s223_s22 }
  0x6b   : > { %s547_s18 = scalar_lea.vmem %s277_s12, 128  ;;  %p887_p5 = scmp.ne.s32.totalorder %s879_s25, 0 }
  0x6c   : > { %p548_p3 = scmp.ne.s32.totalorder %s277_s12, %s547_s18  ;;  %s659_s20 = smov [#allocation7]  }
  0x6d   : > { %s551_s23 = sshll.u32 %s659_s20, 4  ;;  %s552_s23 = int_to_ptr.vmem [resolvable:$false] %s551_s23 }
  0x6e   : > { %p549_p11 = pnand %p548_p3, %p887_p5  ;;  %s553_s30 = scalar_lea.vmem %s552_s23, 256 }
  0x6f   : > { %p554_p7 = scmp.lt.s32.totalorder %s277_s12, %s552_s23  ;;  %p555_p4 = scmp.lt.s32.totalorder %s553_s30, %s547_s18 }
  0x70   : > { %p550_p1 = pneg %p549_p11 }
  0x71   : > { %p556_p13 = por %p555_p4, %p554_p7 }
  0x73   : > { %p557_p9 = pnand %p556_p13, %p550_p1 }
  0x75   : > { %560 = shalt.err (!%p557_p9)
}
  0x76   : > { %s561_s14 = scalar_lea.hbm %s825_s8, 128  ;;  %s565_s4 = scalar_lea.hbm %s874_s2, 256 }
  0x77   : > { %p562_p6 = scmp.ne.s32.totalorder %s825_s8, %s561_s14  ;;  %p566_p8 = scmp.lt.u32.totalorder %s825_s8, %s874_s2 }
  0x78   : > { %p567_p2 = scmp.lt.u32.totalorder %s565_s4, %s561_s14  ;;  %p569_p3 = scmp.lt.u32.totalorder %s561_s14, %s825_s8 }
  0x79   : > { %p563_p12 = pnand %p562_p6, %p887_p5 }
  0x7a   : > { %p568_p10 = por %p567_p2, %p566_p8 }
  0x7b   : > { %p564_p0 = pneg %p563_p12 }
  0x7c   : > { %p570_p11 = por %p569_p3, %p568_p10 }
  0x7e   : > { %p571_p1 = pnand %p570_p11, %p564_p0 }
  0x80   : > { %574 = shalt.err (!%p571_p1)
}
  0x81   : > { %399 = dma.vmem_to_hbm [thread:$0]  (%p887_p5), %s277_s12, 128, %s825_s8, %s263_s17  }
  0x82 PF: > { %s288_s5 = sand.u32 1, %s626_s9   ;;  %p888_p7 = scmp.ne.s32.totalorder %s880_s26, 0 }
  0x83   : > { %p889_p4 = scmp.ge.s32.totalorder %s654_s16, 2  ;;  %s289_s6 = scalar_lea.sflag [#allocation4], %s288_s5 }
  0x85   : > { %p409_p13 = pnand %p889_p4, %p888_p7 }
  0x87   : > { %620 = dma.done.wait (!%p409_p13), %s289_s6, 128  }
  0x88   : > { %622 = vsyncadd (!%p409_p13), %s289_s6, 4294967168  ;;  %s21_s16 = sadd.s32 1, %s654_s16   ;;  %s890_s9 = smov %s630_s10 }
  0x89   : > { %p18_p9 = scmp.ge.s32.totalorder %s21_s16, 4   ;;  %s891_s10 = smov %s634_s11 }
  0x8a   : > { %s892_s11 = smov %s733_s24  ;;  %s893_s12 = smov %s642_s13 }
  0x8b   : > { %s862_s13 = smov 0   ;;  %s894_s14 = smov %s650_s15 }
  0x8c   : > { %s895_s15 = smov %s897_s19  ;;  %20 = sbr.rel (!%p18_p9) target bundleno = 9 (0x9), region = 98 }
  0x93   :  { %294 = vsyncpa [#allocation3], 1 }
  0x94   :  { %296 = vsyncpa [#allocation3 + $0x1], 1 }
  0x95   :  { %297 = vsyncpa [#allocation6], 1 }
  0x96   :  { %299 = vsyncpa [#allocation6 + $0x1], 1 }
  0x97   :  { %300 = vsyncpa [#allocation4], 1 }
  0x98   :  { %302 = vsyncpa [#allocation4 + $0x1], 1 }

</bundles_post_ra>
